<compile_context>
chip_gen: v5e
topology: v5e:2x2
jax: 0.10.0
libtpu: 0.0.40
codegen_flags: <defaults>
</compile_context>

<pallas_src>
import functools

import jax
import jax.numpy as jnp
from jax.experimental import pallas as pl
from jax.experimental.pallas import tpu as pltpu

_BN_EPS = 1e-5


def _round_up(x, m):
    return ((x + m - 1) // m) * m


# ---------------------------------------------------------------------------
# Kernels
# ---------------------------------------------------------------------------
def _linear_bn_relu_kernel(x_ref, w_ref, gamma_ref, beta_ref, o_ref, acc_ref,
                           *, n_actual):
    """Fused x@W (K-tiled, f32 acc) + batch-norm (batch stats) + ReLU."""
    k = pl.program_id(1)

    @pl.when(k == 0)
    def _():
        acc_ref[...] = jnp.zeros_like(acc_ref)

    # bf16 x bf16 -> f32 accumulate on the MXU.
    acc_ref[...] += jnp.dot(x_ref[...], w_ref[...],
                            preferred_element_type=jnp.float32)

    @pl.when(k == pl.num_programs(1) - 1)
    def _():
        y = acc_ref[...]                       # (N_pad, Tc) f32; padded rows == 0
        inv_n = jnp.float32(1.0 / n_actual)
        s = jnp.sum(y, axis=0, keepdims=True)          # zero rows contribute 0
        s2 = jnp.sum(y * y, axis=0, keepdims=True)
        mean = s * inv_n
        var = jnp.maximum(s2 * inv_n - mean * mean, 0.0)   # one-pass, clamped
        y_hat = (y - mean) * jax.lax.rsqrt(var + _BN_EPS)
        out = gamma_ref[...] * y_hat + beta_ref[...]
        o_ref[...] = jnp.maximum(out, 0.0).astype(o_ref.dtype)


def _linear_bias_kernel(x_ref, w_ref, b_ref, o_ref, acc_ref):
    """x@W (K-tiled, f32 acc) + bias  (activation=False path)."""
    k = pl.program_id(1)

    @pl.when(k == 0)
    def _():
        acc_ref[...] = jnp.zeros_like(acc_ref)

    acc_ref[...] += jnp.dot(x_ref[...], w_ref[...],
                            preferred_element_type=jnp.float32)

    @pl.when(k == pl.num_programs(1) - 1)
    def _():
        o_ref[...] = (acc_ref[...] + b_ref[...]).astype(o_ref.dtype)


# ---------------------------------------------------------------------------
# Wrapper
# ---------------------------------------------------------------------------
def linear_block(x, weight, bias, gamma, beta, *, activation=True,
                 tile_cout=256, tile_k=512):
    """Pallas implementation of LinearBlock.forward.

    x:      (N, C_in)  float32
    weight: (C_in, C_out)  (pre-transposed vs torch's (C_out, C_in))
    bias, gamma, beta: (C_out,)
    """
    n, c_in = x.shape
    assert weight.shape[0] == c_in
    c_out = weight.shape[1]

    # TPU-friendly padded shapes: lane=128, sublane=8, MXU-aligned tiles.
    n_pad = _round_up(n, 8)
    tile_cout = min(tile_cout, _round_up(c_out, 128))
    tile_k = min(tile_k, _round_up(c_in, 128))
    c_out_pad = _round_up(c_out, tile_cout)
    k_pad = _round_up(c_in, tile_k)

    # bf16 MXU operands (padding is zeros -> contributes nothing to the dot).
    x_p = jnp.zeros((n_pad, k_pad), jnp.bfloat16).at[:n, :c_in].set(
        x.astype(jnp.bfloat16))
    w_p = jnp.zeros((k_pad, c_out_pad), jnp.bfloat16).at[:c_in, :c_out].set(
        weight.astype(jnp.bfloat16))

    grid = (c_out_pad // tile_cout, k_pad // tile_k)

    x_spec = pl.BlockSpec((n_pad, tile_k), lambda j, k: (0, k))
    w_spec = pl.BlockSpec((tile_k, tile_cout), lambda j, k: (k, j))
    vec_spec = pl.BlockSpec((1, tile_cout), lambda j, k: (0, j))
    out_spec = pl.BlockSpec((n_pad, tile_cout), lambda j, k: (0, j))

    out_shape = jax.ShapeDtypeStruct((n_pad, c_out_pad), jnp.float32)
    scratch = [pltpu.VMEM((n_pad, tile_cout), jnp.float32)]

    compiler_params = pltpu.CompilerParams(
        dimension_semantics=("parallel", "arbitrary"),
        vmem_limit_bytes=48 * 1024 * 1024,
    )
    cost = pl.CostEstimate(
        flops=2 * n_pad * k_pad * c_out_pad,
        transcendentals=c_out_pad if activation else 0,
        bytes_accessed=(x_p.size * 2 + w_p.size * 2 + n_pad * c_out_pad * 4),
    )

    if activation:
        # Bias cancels under training-mode BN mean subtraction -> drop it.
        g_p = jnp.zeros((1, c_out_pad), jnp.float32).at[0, :c_out].set(
            gamma.astype(jnp.float32))
        b_p = jnp.zeros((1, c_out_pad), jnp.float32).at[0, :c_out].set(
            beta.astype(jnp.float32))
        kern = functools.partial(_linear_bn_relu_kernel, n_actual=n)
        out = pl.pallas_call(
            kern,
            out_shape=out_shape,
            grid_spec=pltpu.PrefetchScalarGridSpec(
                num_scalar_prefetch=0,
                grid=grid,
                in_specs=[x_spec, w_spec, vec_spec, vec_spec],
                out_specs=out_spec,
                scratch_shapes=scratch,
            ),
            compiler_params=compiler_params,
            cost_estimate=cost,
        )(x_p, w_p, g_p, b_p)
    else:
        bias_p = jnp.zeros((1, c_out_pad), jnp.float32).at[0, :c_out].set(
            bias.astype(jnp.float32))
        out = pl.pallas_call(
            _linear_bias_kernel,
            out_shape=out_shape,
            grid_spec=pltpu.PrefetchScalarGridSpec(
                num_scalar_prefetch=0,
                grid=grid,
                in_specs=[x_spec, w_spec, vec_spec],
                out_specs=out_spec,
                scratch_shapes=scratch,
            ),
            compiler_params=compiler_params,
            cost_estimate=cost,
        )(x_p, w_p, bias_p)

    return out[:n, :c_out]


# ---------------------------------------------------------------------------
# Reference (pure JAX) -- uses the same bf16-quantized operands so the check
# isolates kernel numerics from the deliberate bf16-input choice.
# ---------------------------------------------------------------------------
def _reference(x, weight, bias, gamma, beta, activation=True):
    xq = x.astype(jnp.bfloat16).astype(jnp.float32)
    wq = weight.astype(jnp.bfloat16).astype(jnp.float32)
    y = jnp.dot(xq, wq, precision=jax.lax.Precision.HIGHEST) + bias
    if not activation:
        return y
    mean = y.mean(axis=0, keepdims=True)
    var = ((y - mean) ** 2).mean(axis=0, keepdims=True)   # biased (training BN)
    y = gamma * (y - mean) / jnp.sqrt(var + _BN_EPS) + beta
    return jnp.maximum(y, 0.0)


if __name__ == "__main__":
    # Small shapes consistent with nn.Linear(in_channels, out_channels).
    N, C_IN, C_OUT = 8, 32, 16

    key = jax.random.PRNGKey(0)
    kx, kw, kb = jax.random.split(key, 3)

    x = jax.random.normal(kx, (N, C_IN), dtype=jnp.float32)

    bound = 1.0 / jnp.sqrt(jnp.float32(C_IN))
    weight = jax.random.uniform(kw, (C_IN, C_OUT), jnp.float32, -bound, bound)
    bias = jax.random.uniform(kb, (C_OUT,), jnp.float32, -bound, bound)
    gamma = jnp.ones((C_OUT,), jnp.float32)   # BatchNorm1d weight init
    beta = jnp.zeros((C_OUT,), jnp.float32)   # BatchNorm1d bias init

    # Fused Linear + BN + ReLU path.
    out = jax.block_until_ready(
        linear_block(x, weight, bias, gamma, beta, activation=True))
    ref = _reference(x, weight, bias, gamma, beta, activation=True)
    assert out.shape == (N, C_OUT)
    assert jnp.allclose(out, ref, atol=1e-3, rtol=1e-3), "mismatch vs reference (BN path)"

    # Linear-only path (activation=False).
    out_lin = jax.block_until_ready(
        linear_block(x, weight, bias, gamma, beta, activation=False))
    ref_lin = _reference(x, weight, bias, gamma, beta, activation=False)
    assert jnp.allclose(out_lin, ref_lin, atol=1e-3, rtol=1e-3), "mismatch vs reference (linear path)"

    print("KERNEL_OK")
</pallas_src>

<mosaic_0001>
module attributes {stable_mosaic.version = 11 : i64} {
  func.func @_linear_bn_relu_kernel(%arg0: i32, %arg1: i32, %arg2: memref<8x128xbf16, #tpu.memory_space<vmem>>, %arg3: memref<128x128xbf16, #tpu.memory_space<vmem>>, %arg4: memref<1x128xf32, #tpu.memory_space<vmem>>, %arg5: memref<1x128xf32, #tpu.memory_space<vmem>>, %arg6: memref<8x128xf32, #tpu.memory_space<vmem>>, %arg7: memref<8x128xf32, #tpu.memory_space<vmem>>) attributes {dimension_semantics = [#tpu.dimension_semantics<parallel>, #tpu.dimension_semantics<arbitrary>], iteration_bounds = array<i64: 1, 1>, scalar_prefetch = 0 : i64, scratch_operands = 1 : i64, tpu.core_type = #tpu.core_type<tc>, window_params = [{transform_indices = @transform_0, window_bounds = array<i64: 8, 128>}, {transform_indices = @transform_1, window_bounds = array<i64: 128, 128>}, {transform_indices = @transform_2, window_bounds = array<i64: 1, 128>}, {transform_indices = @transform_3, window_bounds = array<i64: 1, 128>}, {transform_indices = @transform_4, window_bounds = array<i64: 8, 128>}]} {
    %c0_i32 = arith.constant 0 : i32
    %0 = arith.cmpi eq, %arg1, %c0_i32 : i32
    %1 = arith.extui %0 : i1 to i32
    %c0_i32_0 = arith.constant 0 : i32
    %2 = arith.cmpi ne, %1, %c0_i32_0 : i32
    scf.if %2 {
      %cst_10 = arith.constant 0.000000e+00 : f32
      %12 = vector.broadcast %cst_10 : f32 to vector<8x128xf32>
      %c0_11 = arith.constant 0 : index
      %c0_12 = arith.constant 0 : index
      %13 = vector.load %arg7[%c0_11, %c0_12] : memref<8x128xf32, #tpu.memory_space<vmem>>, vector<8x128xf32>
      tpu.vector_store %arg7[%c0_11, %c0_12], %12 {strides = array<i32>} : memref<8x128xf32, #tpu.memory_space<vmem>>, vector<8x128xf32>,
    } else {
    }
    %c0 = arith.constant 0 : index
    %c0_1 = arith.constant 0 : index
    %3 = vector.load %arg7[%c0, %c0_1] : memref<8x128xf32, #tpu.memory_space<vmem>>, vector<8x128xf32>
    %c0_2 = arith.constant 0 : index
    %c0_3 = arith.constant 0 : index
    %4 = vector.load %arg2[%c0_2, %c0_3] : memref<8x128xbf16, #tpu.memory_space<vmem>>, vector<8x128xbf16>
    %c0_4 = arith.constant 0 : index
    %c0_5 = arith.constant 0 : index
    %5 = vector.load %arg3[%c0_4, %c0_5] : memref<128x128xbf16, #tpu.memory_space<vmem>>, vector<128x128xbf16>
    %cst = arith.constant dense<0.000000e+00> : vector<8x128xf32>
    %6 = tpu.matmul %4, %5, %cst {dimension_numbers = #tpu.dot_dimension_numbers<[1], [0], [0], [1], [0, 0, 1, 1], [], []>} : vector<8x128xbf16>, vector<128x128xbf16>, vector<8x128xf32> -> vector<8x128xf32>
    %7 = arith.addf %3, %6 : vector<8x128xf32>
    %c0_6 = arith.constant 0 : index
    %c0_7 = arith.constant 0 : index
    %8 = vector.load %arg7[%c0_6, %c0_7] : memref<8x128xf32, #tpu.memory_space<vmem>>, vector<8x128xf32>
    tpu.vector_store %arg7[%c0_6, %c0_7], %7 {strides = array<i32>} : memref<8x128xf32, #tpu.memory_space<vmem>>, vector<8x128xf32>,
    %c0_i32_8 = arith.constant 0 : i32
    %9 = arith.cmpi eq, %arg1, %c0_i32_8 : i32
    %10 = arith.extui %9 : i1 to i32
    %c0_i32_9 = arith.constant 0 : i32
    %11 = arith.cmpi ne, %10, %c0_i32_9 : i32
    scf.if %11 {
      %c0_10 = arith.constant 0 : index
      %c0_11 = arith.constant 0 : index
      %12 = vector.load %arg7[%c0_10, %c0_11] : memref<8x128xf32, #tpu.memory_space<vmem>>, vector<8x128xf32>
      %cst_12 = arith.constant dense<0.000000e+00> : vector<128xf32>
      %13 = vector.multi_reduction <add>, %12, %cst_12 [0] : vector<8x128xf32> to vector<128xf32>
      %14 = vector.shape_cast %13 : vector<128xf32> to vector<1x128xf32>
      %15 = arith.mulf %12, %12 : vector<8x128xf32>
      %cst_13 = arith.constant dense<0.000000e+00> : vector<128xf32>
      %16 = vector.multi_reduction <add>, %15, %cst_13 [0] : vector<8x128xf32> to vector<128xf32>
      %17 = vector.shape_cast %16 : vector<128xf32> to vector<1x128xf32>
      %cst_14 = arith.constant 1.250000e-01 : f32
      %18 = vector.broadcast %cst_14 : f32 to vector<1x128xf32>
      %19 = arith.mulf %14, %18 : vector<1x128xf32>
      %cst_15 = arith.constant 1.250000e-01 : f32
      %20 = vector.broadcast %cst_15 : f32 to vector<1x128xf32>
      %21 = arith.mulf %17, %20 : vector<1x128xf32>
      %22 = arith.mulf %19, %19 : vector<1x128xf32>
      %23 = arith.subf %21, %22 : vector<1x128xf32>
      %cst_16 = arith.constant 0.000000e+00 : f32
      %24 = vector.broadcast %cst_16 : f32 to vector<1x128xf32>
      %25 = arith.maximumf %23, %24 : vector<1x128xf32>
      %26 = vector.broadcast %19 : vector<1x128xf32> to vector<8x128xf32>
      %27 = arith.subf %12, %26 : vector<8x128xf32>
      %cst_17 = arith.constant 9.99999974E-6 : f32
      %28 = vector.broadcast %cst_17 : f32 to vector<1x128xf32>
      %29 = arith.addf %25, %28 : vector<1x128xf32>
      %30 = math.rsqrt %29 : vector<1x128xf32>
      %31 = vector.broadcast %30 : vector<1x128xf32> to vector<8x128xf32>
      %32 = arith.mulf %27, %31 : vector<8x128xf32>
      %c0_18 = arith.constant 0 : index
      %c0_19 = arith.constant 0 : index
      %33 = vector.load %arg4[%c0_18, %c0_19] : memref<1x128xf32, #tpu.memory_space<vmem>>, vector<1x128xf32>
      %34 = vector.broadcast %33 : vector<1x128xf32> to vector<8x128xf32>
      %35 = arith.mulf %34, %32 : vector<8x128xf32>
      %c0_20 = arith.constant 0 : index
      %c0_21 = arith.constant 0 : index
      %36 = vector.load %arg5[%c0_20, %c0_21] : memref<1x128xf32, #tpu.memory_space<vmem>>, vector<1x128xf32>
      %37 = vector.broadcast %36 : vector<1x128xf32> to vector<8x128xf32>
      %38 = arith.addf %35, %37 : vector<8x128xf32>
      %cst_22 = arith.constant 0.000000e+00 : f32
      %39 = vector.broadcast %cst_22 : f32 to vector<8x128xf32>
      %40 = arith.maximumf %38, %39 : vector<8x128xf32>
      %c0_23 = arith.constant 0 : index
      %c0_24 = arith.constant 0 : index
      %41 = vector.load %arg6[%c0_23, %c0_24] : memref<8x128xf32, #tpu.memory_space<vmem>>, vector<8x128xf32>
      tpu.vector_store %arg6[%c0_23, %c0_24], %40 {strides = array<i32>} : memref<8x128xf32, #tpu.memory_space<vmem>>, vector<8x128xf32>,
    } else {
    }
    return
  }
  func.func @transform_0(%arg0: i32, %arg1: i32) -> (i32, i32) {
    %c0_i32 = arith.constant 0 : i32
    %c0_i32_0 = arith.constant 0 : i32
    return %c0_i32, %arg1 : i32, i32
  }
  func.func @transform_1(%arg0: i32, %arg1: i32) -> (i32, i32) {
    %c0_i32 = arith.constant 0 : i32
    return %arg1, %arg0 : i32, i32
  }
  func.func @transform_2(%arg0: i32, %arg1: i32) -> (i32, i32) {
    %c0_i32 = arith.constant 0 : i32
    %c0_i32_0 = arith.constant 0 : i32
    return %c0_i32, %arg0 : i32, i32
  }
  func.func @transform_3(%arg0: i32, %arg1: i32) -> (i32, i32) {
    %c0_i32 = arith.constant 0 : i32
    %c0_i32_0 = arith.constant 0 : i32
    return %c0_i32, %arg0 : i32, i32
  }
  func.func @transform_4(%arg0: i32, %arg1: i32) -> (i32, i32) {
    %c0_i32 = arith.constant 0 : i32
    %c0_i32_0 = arith.constant 0 : i32
    return %c0_i32, %arg0 : i32, i32
  }
}

</mosaic_0001>

<bundles_post_ra>
// kernel: tpu_custom_call.1
= control target key start
LH: loop header
LB: loop body
LE: loop exit
PB: predicated region body
PF: predicated region fallthrough
CT: control target
= control target key end

     0   :  { %9 = vsyncpa [#allocation4], 0  ;;  %s371_s0 = inlined_call_operand.hbm [shape: bf16[8,128], index: 0, kind: input, shape index: {}]   ;;  %s372_s1 = inlined_call_operand.hbm [shape: bf16[128,128], index: 1, kind: input, shape index: {}]   ;;  %s373_s2 = inlined_call_operand.vmem [shape: f32[1,128], index: 2, kind: input, shape index: {}]   ;;  %s374_s3 = inlined_call_operand.vmem [shape: f32[1,128], index: 3, kind: input, shape index: {}]   ;;  %s375_s4 = inlined_call_operand.hbm [shape: f32[8,128], index: 4, kind: output, shape index: {}]  }
   0x1   :  { %10 = vsyncpa [#allocation7], 0 }
   0x2   :  { %11 = vsyncpa [#allocation5], 0  ;;  %s17_s17 = sshll.u32 %s371_s0, 4  ;;  %s326_s18 = smov [#allocation3]   ;;  %s18_s17 = int_to_ptr.hbm [resolvable:$true] %s17_s17 }
   0x3   :  { %s19_s19 = sshll.u32 %s326_s18, 4  ;;  %s27_s22 = sshll.u32 %s372_s1, 4  ;;  %s20_s19 = int_to_ptr.vmem [resolvable:$true] %s19_s19  ;;  %s28_s22 = int_to_ptr.hbm [resolvable:$true] %s27_s22 }
   0x4   :  { %22 = dma.hbm_to_vmem [thread:$0]  %s18_s17, 64, %s20_s19, [#allocation4]  }
   0x5   :  { %s327_s23 = smov [#allocation6]   ;;  %s328_s25 = smov 64  }
   0x6   :  { %s29_s24 = sshll.u32 %s327_s23, 4  ;;  %s329_s26 = smov 4   ;;  %s30_s24 = int_to_ptr.vmem [resolvable:$true] %s29_s24 }
   0x7   :  { %35 = dma.hbm_to_vmem [thread:$0]  %s28_s22, 1024, %s30_s24, [#allocation7], %s328_s25, %s328_s25, %s329_s26  }
   0x8   :  { %320 = dma.done.wait [#allocation4], 64  }
   0x9   :  { %321 = vsyncadd [#allocation4], 4294967232 }
   0xa   :  { %322 = dma.done.wait [#allocation7], 1024  }
   0xb   :  { %323 = vsyncadd [#allocation7], 4294966272  ;;  %v238_v0 = vld [vmem:[#allocation6 + $0x38] sm:$0xff]  ;;  %v237_v1 = vld [vmem:[#allocation6 + $0x30] sm:$0xff]  ;;  %s330_s29 = smov [#allocation8]   ;;  %s188_s7 = sshll.u32 %s375_s4, 4  ;;  %s189_s7 = int_to_ptr.hbm [resolvable:$true] %s188_s7 }
   0xc   :  { %119 = vmatpush.bf16.msra.mxu0 %v238_v0  ;;  %v236_v2 = vld [vmem:[#allocation6 + $0x28] sm:$0xff]  ;;  %v235_v3 = vld [vmem:[#allocation6 + $0x20] sm:$0xff]  ;;  %v234_v4 = vld [vmem:[#allocation6 + $0x18] sm:$0xff]  ;;  %s186_s30 = sshll.u32 %s330_s29, 4  ;;  %s187_s30 = int_to_ptr.vmem [resolvable:$true] %s186_s30 }
   0xd   :  { %v233_v5 = vld [vmem:[#allocation6 + $0x10] sm:$0xff]  ;;  %v232_v6 = vld [vmem:[#allocation6 + $0x8] sm:$0xff]  ;;  %v231_v7 = vld [vmem:[#allocation6] sm:$0xff] }
   0xe   :  { %v54_v8 = vld [vmem:[#allocation3] sm:$0xf] }
   0xf   :  { %v244_v37 = vld [vmem:[%s373_s2] ss:$0 sm:$0xff] }
  0x10   :  { %120 = vmatpush.bf16.msra.mxu0 %v237_v1  ;;  %v245_v40 = vld [vmem:[%s374_s3] ss:$0 sm:$0xff] }
  0x14   :  { %121 = vmatpush.bf16.msra.mxu0 %v236_v2 }
  0x18   :  { %122 = vmatpush.bf16.msra.mxu0 %v235_v3 }
  0x1c   :  { %123 = vmatpush.bf16.msra.mxu0 %v234_v4 }
  0x20   :  { %124 = vmatpush.bf16.msra.mxu0 %v233_v5 }
  0x24   :  { %125 = vmatpush.bf16.msra.mxu0 %v232_v6 }
  0x28   :  { %126 = vmatpush.bf16.msra.mxu0 %v231_v7 }
  0x2b   :  { %127 = vmatmul.bf16.vlgmr.msra.gmra.mxu0 %v54_v8 }
  0xa8   :  { %v128_v9 = vpop.f32.mrf.mxu0 }
  0xa9   :  { %v138_v10 = vrot.slane %v128_v9, 4  ;;  %v144_v11 = vmul.f32 %v128_v9, %v128_v9 }
  0xab   :  { %v139_v12 = vadd.f32 %v138_v10, %v128_v9  ;;  %v145_v13 = vrot.slane %v144_v11, 4 }
  0xad   :  { %v140_v14 = vrot.slane %v139_v12, 2  ;;  %v146_v15 = vadd.f32 %v145_v13, %v144_v11 }
  0xaf   :  { %v141_v16 = vadd.f32 %v140_v14, %v139_v12  ;;  %v147_v17 = vrot.slane %v146_v15, 2 }
  0xb0   :  { %v130_v18 = vpop.f32.mrf.mxu0 }
  0xb1   :  { %v142_v19 = vrot.slane %v141_v16, 1  ;;  %v148_v20 = vadd.f32 %v147_v17, %v146_v15 }
  0xb3   :  { %v143_v21 = vadd.f32 %v142_v19, %v141_v16  ;;  %v149_v22 = vrot.slane %v148_v20, 1 }
  0xb5   :  { %v150_v23 = vadd.f32 %v149_v22, %v148_v20  ;;  %v151_v24 = vmul.f32 0.125, %v143_v21 }
  0xb7   :  { %v152_v25 = vmul.f32 0.125, %v150_v23  ;;  %v153_v26 = vmul.f32 %v151_v24, %v151_v24  ;;  %v156_v36 = vsub.f32 %v128_v9, %v151_v24 }
  0xb9   :  { %v154_v27 = vsub.f32 %v152_v25, %v153_v26 }
  0xbb   :  { %v155_v28 = vmax.f32 %v154_v27, 0.0 }
  0xbd   :  { %v157_v29 = vadd.f32 1e-05, %v155_v28 }
  0xbf   :  { %246 = vrsqrt.f32 %v157_v29  ;;  %vm164_vm1 = vweird.f32 %v157_v29 }
  0xc5   :  { %v247_v30 = vpop.eup %246 }
  0xc6   :  { %v159_v31 = vmul.f32 %v247_v30, %v157_v29  ;;  %vm165_vm0 = vweird.f32 %v247_v30 }
  0xc7   :  { %vm166_vm2 = vmor %vm164_vm1, %vm165_vm0 }
  0xc8   :  { %v160_v32 = vmul.f32 %v247_v30, %v159_v31 }
  0xca   :  { %v161_v33 = vmul.f32 0.5, %v160_v32 }
  0xcc   :  { %v162_v34 = vsub.f32 1.5, %v161_v33 }
  0xce   :  { %v163_v35 = vmul.f32 %v247_v30, %v162_v34 }
  0xd0   :  { %v167_v38 = vsel %vm166_vm2, %v247_v30, %v163_v35 }
  0xd1   :  { %v168_v39 = vmul.f32 %v167_v38, %v156_v36 }
  0xd3   :  { %v173_v41 = vmul.f32 %v244_v37, %v168_v39 }
  0xd5   :  { %v178_v42 = vadd.f32 %v245_v40, %v173_v41 }
  0xd7   :  { %v179_v43 = vmax.f32 %v178_v42, 0.0 }
  0xd9   :  { %180 = vst [vmem:[#allocation8] sm:$0xff] %v179_v43 }
  0xda   :  { %191 = dma.vmem_to_hbm [thread:$0]  %s187_s30, 128, %s189_s7, [#allocation5]  }
  0xdb   :  { %324 = dma.done.wait [#allocation5], 128  }
  0xdc   :  { %325 = vsyncadd [#allocation5], 4294967168 }
  0xdd   :  { %196 = vsyncpa [#allocation4], 1 }
  0xde   :  { %197 = vsyncpa [#allocation7], 1 }
  0xdf   :  { %198 = vsyncpa [#allocation5], 1 }

</bundles_post_ra>
